<compile_context>
chip_gen: v6e
topology: v6e:2x2x1
jax: 0.10.0
libtpu: 0.0.40
codegen_flags: <defaults>
</compile_context>

<pallas_src>
import functools

import jax
import jax.numpy as jnp
from jax.experimental import pallas as pl
from jax.experimental.pallas import tpu as pltpu


def _head_kernel(hs0_ref, w_ref, out_ref, *, approx_sigmoid):
    """One node-row tile per grid step.

    hs0_ref : (TN, D)  degree-0 SE3 output features for this row tile
    w_ref   : (D, P)   all 15 Cblock weights fused column-wise, zero-padded to
                       P = round_up(T*T, 128) lanes (resident, constant index_map)
    out_ref : (TN, P)  lane-dense sigmoid(logits) slab for this row tile
    """
    logits = jnp.dot(hs0_ref[...], w_ref[...], preferred_element_type=jnp.float32)
    if approx_sigmoid:
        # v7x: keep both the exp and the reciprocal on the EUP slot.
        sig = pl.reciprocal(1.0 + jnp.exp(-logits), approx=True)
    else:
        sig = jax.nn.sigmoid(logits)
    out_ref[...] = sig.astype(out_ref.dtype)


def _pick_row_tile(n_rows, target=4096):
    """Node tile: large enough to amortize the ~0.35 us/step pipeline overhead,
    small enough for v5e's 16 MiB default scoped VMEM, and (when possible)
    yielding >= 2 grid steps so both v7x TensorCores get work."""
    if n_rows <= 16:
        return n_rows                       # single block == full extent
    half = (n_rows + 1) // 2
    tn = min(target, half)
    tn = max(8, (tn // 8) * 8)              # sublane (8) alignment
    return tn


@functools.partial(jax.jit, static_argnames=("row_tile", "approx_sigmoid", "out_dtype"))
def se3_wrapper_head(hs0, cwt, *, row_tile=None, approx_sigmoid=False,
                     out_dtype=jnp.float32):
    """hs0: (N, D) float32 degree-0 SE3 features; cwt: (T, D, T) Cblock weights
    pre-transposed to (in, out) layout per type.  Returns cs: (T, N, T) =
    sigmoid(einsum('nd,tdk->tnk', hs0, cwt)), matching the torch forward."""
    N, D = hs0.shape
    T = cwt.shape[0]
    assert cwt.shape == (T, D, T)

    # Fuse the T per-type (D, T) weights into one (D, T*T) matrix so a single
    # MXU matmul computes every Cblock at once; pad columns to a multiple of
    # 128 for a lane-dense (unmasked) output store.  Trace-time, tiny.
    w2d = jnp.transpose(cwt, (1, 0, 2)).reshape(D, T * T)          # [d, t*T + k]
    P = ((T * T + 127) // 128) * 128
    w_pad = jnp.pad(w2d, ((0, 0), (0, P - T * T)))                 # (D, P)

    # Tile only over the node axis; weights stay resident (constant index_map).
    if row_tile is None:
        tn = _pick_row_tile(N)
    else:
        tn = min(row_tile, N)
        if tn < N:
            tn = max(8, (tn // 8) * 8)
    grid = (pl.cdiv(N, tn),)                # ragged last tile handled by Pallas

    cost = pl.CostEstimate(
        flops=2 * N * D * P,
        transcendentals=N * P,
        bytes_accessed=(N * D + D * P) * 4 + N * P * jnp.dtype(out_dtype).itemsize,
    )

    out = pl.pallas_call(
        functools.partial(_head_kernel, approx_sigmoid=approx_sigmoid),
        out_shape=jax.ShapeDtypeStruct((N, P), out_dtype),
        grid_spec=pl.GridSpec(
            grid=grid,
            in_specs=[
                pl.BlockSpec((tn, D), lambda i: (i, 0)),   # hs0 row tile
                pl.BlockSpec((D, P), lambda i: (0, 0)),    # fused weights (resident)
            ],
            out_specs=pl.BlockSpec((tn, P), lambda i: (i, 0)),
        ),
        compiler_params=pltpu.CompilerParams(
            dimension_semantics=("parallel",),
        ),
        cost_estimate=cost,
    )(hs0, w_pad)

    # Layout plumbing back to the torch output shape, fused by XLA inside this
    # jit (single copy): (N, T*T) -> (N, T, T) -> (T, N, T); matches
    # einsum('nd,tdk->tnk').  Padded lanes (sigmoid(0)=0.5) are sliced off.
    cs = out[:, : T * T].reshape(N, T, T).transpose(1, 0, 2)
    return cs


def _reference_head(hs0, cwt):
    # Pure-JAX reference mirroring the torch forward's returned value.
    return jax.nn.sigmoid(jnp.einsum("nd,tdk->tnk", hs0, cwt))


if __name__ == "__main__":
    # Module hyperparameters (defaults of SE3TransformerWrapper.__init__)
    l0_out_features = 32
    ntypes = 15
    N = 64   # number of graph nodes (small synthetic graph)

    key = jax.random.PRNGKey(0)
    k_hs, k_cw = jax.random.split(key, 2)

    # Stand-in for the SE3 transformer degree-0 output hs['0'] of shape
    # (N, l0_out_features, 1); squeeze(2) -> (N, l0_out_features).
    hs0 = jax.random.normal(k_hs, (N, l0_out_features), dtype=jnp.float32)

    # Cblock weights, pre-transposed to (in, out) layout per type.
    cwt = 0.1 * jax.random.normal(k_cw, (ntypes, l0_out_features, ntypes), jnp.float32)

    cs = se3_wrapper_head(hs0, cwt)
    cs = jax.block_until_ready(cs)

    cs_ref = _reference_head(hs0, cwt)
    assert cs.shape == (ntypes, N, ntypes), cs.shape
    assert jnp.allclose(cs, cs_ref, atol=1e-5, rtol=1e-5), "mismatch vs reference"

    print("KERNEL_OK")
</pallas_src>

<mosaic_0001>
module attributes {stable_mosaic.version = 11 : i64} {
  func.func @_head_kernel(%arg0: i32, %arg1: memref<32x32xf32, #tpu.memory_space<vmem>>, %arg2: memref<32x256xf32, #tpu.memory_space<vmem>>, %arg3: memref<32x256xf32, #tpu.memory_space<vmem>>) attributes {dimension_semantics = [#tpu.dimension_semantics<parallel>], iteration_bounds = array<i64: 2>, scalar_prefetch = 0 : i64, scratch_operands = 0 : i64, tpu.core_type = #tpu.core_type<tc>, window_params = [{transform_indices = @transform_0, window_bounds = array<i64: 32, 32>}, {pipeline_mode = #tpu.pipeline_mode<synchronous>, transform_indices = @transform_1, window_bounds = array<i64: 32, 256>}, {transform_indices = @transform_2, window_bounds = array<i64: 32, 256>}]} {
    %c0 = arith.constant 0 : index
    %c0_0 = arith.constant 0 : index
    %0 = vector.load %arg1[%c0, %c0_0] : memref<32x32xf32, #tpu.memory_space<vmem>>, vector<32x32xf32>
    %c0_1 = arith.constant 0 : index
    %c0_2 = arith.constant 0 : index
    %1 = vector.load %arg2[%c0_1, %c0_2] : memref<32x256xf32, #tpu.memory_space<vmem>>, vector<32x256xf32>
    %cst = arith.constant dense<0.000000e+00> : vector<32x256xf32>
    %2 = tpu.matmul %0, %1, %cst {dimension_numbers = #tpu.dot_dimension_numbers<[1], [0], [0], [1], [0, 0, 1, 1], [], []>} : vector<32x32xf32>, vector<32x256xf32>, vector<32x256xf32> -> vector<32x256xf32>
    %3 = arith.negf %2 : vector<32x256xf32>
    %4 = math.exp %3 : vector<32x256xf32>
    %cst_3 = arith.constant 1.000000e+00 : f32
    %5 = vector.broadcast %cst_3 : f32 to vector<32x256xf32>
    %6 = arith.addf %5, %4 : vector<32x256xf32>
    %7 = arith.divf %5, %6 : vector<32x256xf32>
    %c0_4 = arith.constant 0 : index
    %c0_5 = arith.constant 0 : index
    %8 = vector.load %arg3[%c0_4, %c0_5] : memref<32x256xf32, #tpu.memory_space<vmem>>, vector<32x256xf32>
    tpu.vector_store %arg3[%c0_4, %c0_5], %7 {strides = array<i32>} : memref<32x256xf32, #tpu.memory_space<vmem>>, vector<32x256xf32>,
    return
  }
  func.func @transform_0(%arg0: i32) -> (i32, i32) {
    %c0_i32 = arith.constant 0 : i32
    %c0_i32_0 = arith.constant 0 : i32
    return %arg0, %c0_i32 : i32, i32
  }
  func.func @transform_1(%arg0: i32) -> (i32, i32) {
    %c0_i32 = arith.constant 0 : i32
    %c0_i32_0 = arith.constant 0 : i32
    %c0_i32_1 = arith.constant 0 : i32
    return %c0_i32, %c0_i32_0 : i32, i32
  }
  func.func @transform_2(%arg0: i32) -> (i32, i32) {
    %c0_i32 = arith.constant 0 : i32
    %c0_i32_0 = arith.constant 0 : i32
    return %arg0, %c0_i32 : i32, i32
  }
}

</mosaic_0001>

<bundles_post_ra>
// kernel: se3_wrapper_head.1
= control target key start
LH: loop header
LB: loop body
LE: loop exit
PB: predicated region body
PF: predicated region fallthrough
CT: control target
= control target key end

     0   :  { %s475_s9 = smov 0   ;;  %s520_s0 = inlined_call_operand.vmem [shape: f32[64,32], index: 0, kind: input, shape index: {}]   ;;  %s521_s1 = inlined_call_operand.vmem [shape: f32[32,256], index: 1, kind: input, shape index: {}]   ;;  %s522_s2 = inlined_call_operand.vmem [shape: f32[64,256], index: 2, kind: output, shape index: {}]  }
   0x1 LB: > { %s377_s10 = sadd.s32 4294967295, %s457_s9   ;;  %p381_p0 = scmp.ge.s32.totalorder %s457_s9, 1  ;;  %s457_s9 = sphi %s475_s9, %s12_s9  }
   0x2   : > { %p113_p1 = scmp.lt.s32.totalorder %s457_s9, 3 }
   0x4   : > { %p114_p2 = pnand %p381_p0, %p113_p1 }
   0x5   : > { %s382_s17 = sshll.u32 (!%p114_p2), %s377_s10, 2 }
   0x6   : > { %117 = sbr.rel (%p114_p2) target bundleno = 255 (0xff), region = 28  ;;  %p137_p3 = scmp.lt.s32.totalorder (!%p114_p2), %s382_s17, 7 }
   0xb   : > { %v160_v0 = vld [vmem:[%s521_s1 + $0x38] sm:$0xff]  ;;  %v159_v1 = vld [vmem:[%s521_s1 + $0x30] sm:$0xff]  ;;  %v158_v2 = vld [vmem:[%s521_s1 + $0x28] sm:$0xff]  ;;  %s524_s17 = smov (!%p137_p3, %s382_s17), 7  ;;  %vm161_vm0 = vcmask 261120   ;;  %v459_v10 = vmov 0.0  }
   0xc   : > { %198 = vmatprep.subr.mxu0 %v160_v0  ;;  %402 = vmatprep.subr.mxu1 %v160_v0  ;;  %v157_v3 = vld [vmem:[%s521_s1 + $0x20] sm:$0xff]  ;;  %v156_v4 = vld [vmem:[%s521_s1 + $0x18] sm:$0xff]  ;;  %v155_v5 = vld [vmem:[%s521_s1 + $0x10] sm:$0xff]  ;;  %s383_s28 = sshll.u32 %s524_s17, 3  ;;  %s401_s4 = sshll.u32 %s524_s17, 4 }
   0xd   : > { %199 = vmatpush1.msra.mxu0 %v159_v1  ;;  %406 = vmatpush1.msra.mxu1 %v159_v1  ;;  %v154_v6 = vld [vmem:[%s521_s1 + $0x8] sm:$0xff]  ;;  %v153_v7 = vld [vmem:[%s521_s1] sm:$0xff]  ;;  %s140_s3 = scalar_lea.vmem %s520_s0, %s383_s28  ;;  %s147_s7 = scalar_lea.vmem %s522_s2, %s401_s4 }
   0xe   : > { %200 = vmatprep.subr.mxu0 %v158_v2  ;;  %403 = vmatprep.subr.mxu1 %v158_v2  ;;  %v149_v8 = vld [vmem:[%s140_s3] sm:$0xff]  ;;  %v151_v9 = vld [vmem:[%s140_s3 + $0x10] sm:$0xff]  ;;  %v150_v11 = vld [vmem:[%s140_s3 + $0x8] sm:$0xff] }
   0xf   : > { %201 = vmatpush1.msra.mxu0 %v157_v3  ;;  %407 = vmatpush1.msra.mxu1 %v157_v3  ;;  %v152_v12 = vld [vmem:[%s140_s3 + $0x18] sm:$0xff] }
  0x10   : > { %202 = vmatprep.subr.mxu0 %v156_v4  ;;  %404 = vmatprep.subr.mxu1 %v156_v4 }
  0x11   : > { %203 = vmatpush1.msra.mxu0 %v155_v5  ;;  %408 = vmatpush1.msra.mxu1 %v155_v5 }
  0x12   : > { %204 = vmatprep.subr.mxu0 %v154_v6  ;;  %405 = vmatprep.subr.mxu1 %v154_v6 }
  0x13   : > { %205 = vmatpush1.msra.mxu0 %v153_v7  ;;  %409 = vmatpush1.msra.mxu1 %v153_v7 }
  0x14   : > { %238 = vmatprep.mubr.f32.mxu0 %v459_v10  ;;  %250 = vmatprep.mubr.f32.mxu1 %v459_v10 }
  0x15   : > { %387 = vmatmul.mubr.msk.f32.vlgmr.msra.gmra.mxu0 %vm161_vm0, %v149_v8  ;;  %389 = vmatmul.mubr.msk.f32.vlgmr.msra.gmra.mxu1 %vm161_vm0, %v151_v9 }
  0x16   : > { %244 = vmatprep.mubr.f32.mxu0 %v459_v10  ;;  %256 = vmatprep.mubr.f32.mxu1 %v459_v10 }
  0x19   : > { %388 = vmatmul.mubr.msk.f32.gmra.mxu0 %vm161_vm0, %v150_v11  ;;  %390 = vmatmul.mubr.msk.f32.gmra.mxu1 %vm161_vm0, %v152_v12 }
  0xd5   : > { %v240_v13 = vpop.f32.mrf.mxu0  ;;  %v252_v14 = vpop.f32.mrf.mxu1 }
  0xd6   : > { %v391_v15 = vmul.f32 -1.442695, %v240_v13  ;;  %v395_v16 = vmul.f32 -1.442695, %v252_v14 }
  0xd7   : > { %v242_v17 = vpop.f32.mrf.mxu0  ;;  %v254_v18 = vpop.f32.mrf.mxu1 }
  0xd8   : > { %419 = vpow2.f32 %v391_v15  ;;  %v392_v19 = vmul.f32 -1.442695, %v242_v17  ;;  %v396_v20 = vmul.f32 -1.442695, %v254_v18 }
  0xd9   : > { %421 = vpow2.f32 %v395_v16  ;;  %v246_v21 = vpop.f32.mrf.mxu0  ;;  %v258_v22 = vpop.f32.mrf.mxu1 }
  0xda   : > { %423 = vpow2.f32 %v392_v19  ;;  %v393_v23 = vmul.f32 -1.442695, %v246_v21  ;;  %v397_v24 = vmul.f32 -1.442695, %v258_v22 }
  0xdb   : > { %425 = vpow2.f32 %v396_v20  ;;  %v248_v25 = vpop.f32.mrf.mxu0  ;;  %v260_v26 = vpop.f32.mrf.mxu1 }
  0xdc   : > { %427 = vpow2.f32 %v393_v23  ;;  %v394_v27 = vmul.f32 -1.442695, %v248_v25  ;;  %v398_v28 = vmul.f32 -1.442695, %v260_v26 }
  0xdd   : > { %429 = vpow2.f32 %v397_v24 }
  0xde   : > { %431 = vpow2.f32 %v394_v27 }
  0xdf   : > { %433 = vpow2.f32 %v398_v28 }
  0xe5   : > { %v420_v29 = vpop.eup %419 }
  0xe6   : > { %v422_v30 = vpop.eup %421  ;;  %v287_v31 = vadd.f32 1.0, %v420_v29 }
  0xe7   : > { %v424_v32 = vpop.eup %423  ;;  %v291_v33 = vadd.f32 1.0, %v422_v30 }
  0xe8   : > { %v426_v34 = vpop.eup %425  ;;  %435 = vrcp.f32 %v287_v31  ;;  %v288_v35 = vadd.f32 1.0, %v424_v32 }
  0xe9   : > { %v428_v36 = vpop.eup %427  ;;  %v292_v40 = vadd.f32 1.0, %v426_v34 }
  0xea   : > { %v430_v37 = vpop.eup %429  ;;  %437 = vrcp.f32 %v288_v35  ;;  %v289_v38 = vadd.f32 1.0, %v428_v36 }
  0xeb   : > { %v432_v39 = vpop.eup %431  ;;  %439 = vrcp.f32 %v291_v33  ;;  %v293_v41 = vadd.f32 1.0, %v430_v37 }
  0xec   : > { %v434_v42 = vpop.eup %433  ;;  %441 = vrcp.f32 %v289_v38  ;;  %v290_v43 = vadd.f32 1.0, %v432_v39 }
  0xed   : > { %443 = vrcp.f32 %v293_v41  ;;  %v294_v44 = vadd.f32 1.0, %v434_v42 }
  0xee   : > { %445 = vrcp.f32 %v290_v43 }
  0xef   : > { %447 = vrcp.f32 %v292_v40 }
  0xf0   : > { %449 = vrcp.f32 %v294_v44 }
  0xf5   : > { %v436_v45 = vpop.eup %435 }
  0xf6   : > { %311 = vst [vmem:[%s147_s7] sm:$0xff] %v436_v45 }
  0xf7   : > { %v438_v46 = vpop.eup %437 }
  0xf8   : > { %v440_v47 = vpop.eup %439  ;;  %312 = vst [vmem:[%s147_s7 + $0x8] sm:$0xff] %v438_v46 }
  0xf9   : > { %v442_v48 = vpop.eup %441  ;;  %315 = vst [vmem:[%s147_s7 + $0x20] sm:$0xff] %v440_v47 }
  0xfa   : > { %v444_v49 = vpop.eup %443  ;;  %313 = vst [vmem:[%s147_s7 + $0x10] sm:$0xff] %v442_v48 }
  0xfb   : > { %v446_v50 = vpop.eup %445  ;;  %317 = vst [vmem:[%s147_s7 + $0x30] sm:$0xff] %v444_v49 }
  0xfc   : > { %v448_v51 = vpop.eup %447  ;;  %314 = vst [vmem:[%s147_s7 + $0x18] sm:$0xff] %v446_v50 }
  0xfd   : > { %v450_v52 = vpop.eup %449  ;;  %316 = vst [vmem:[%s147_s7 + $0x28] sm:$0xff] %v448_v51 }
  0xfe   : > { %318 = vst [vmem:[%s147_s7 + $0x38] sm:$0xff] %v450_v52 }
  0xff PF: > { %s12_s9 = sadd.s32 1, %s457_s9  }
 0x100   : > { %p9_p4 = scmp.ge.s32.totalorder %s12_s9, 4  }
 0x102   :  { %11 = sbr.rel (!%p9_p4) target bundleno = 1 (0x1), region = 58 }

</bundles_post_ra>
